<compile_context>
chip_gen: v5e
topology: v5e:2x2
jax: 0.10.0
libtpu: 0.0.40
codegen_flags: <defaults>
</compile_context>

<pallas_src>
import functools

import jax
import jax.numpy as jnp
from jax.experimental import pallas as pl
from jax.experimental.pallas import tpu as pltpu


def _relu6_kernel(x_ref, o_ref):
    x = x_ref[...]
    zero = jnp.array(0, x.dtype)
    six = jnp.array(6, x.dtype)
    o_ref[...] = jnp.minimum(jnp.maximum(x, zero), six)


def _round_up(a, b):
    return ((a + b - 1) // b) * b


def _pick_lane_width(n):
    """Widest lane-dense last dim that divides n exactly; else 128 + pad."""
    for c in (2048, 1024, 512, 256, 128):
        if n % c == 0:
            return c, False
    return 128, True


@functools.partial(jax.jit, static_argnames=("block_bytes",))
def relu6_pallas(x, *, block_bytes=2 * 1024 * 1024):
    """Elementwise ReLU6 on an arbitrary-shaped array (NCHW or anything else)."""
    orig_shape = x.shape
    dtype = x.dtype
    n = x.size
    if n == 0:
        return x

    itemsize = jnp.dtype(dtype).itemsize
    x_flat = x.reshape(-1)

    # Lane-dense 2D view; pad only for sizes not divisible by 128 (<=127 zeros).
    lane, need_pad = _pick_lane_width(n)
    if need_pad:
        x_flat = jnp.pad(x_flat, (0, _round_up(n, lane) - n))
    rows = x_flat.size // lane
    x2d = x_flat.reshape(rows, lane)

    # Sublane granularity of the packed native tile for this dtype.
    sub = max(8, 32 // itemsize)  # f32 -> 8, bf16 -> 16, int8/fp8 -> 32

    # Biggest block rows within the byte budget (dtype-aware), floor to `sub`.
    max_rows = max(sub, (block_bytes // (lane * itemsize)) // sub * sub)
    if rows > max_rows:
        block_rows = max_rows
    elif rows >= 2 * sub:
        # Keep >= 2 grid steps so the "parallel" axis can shard across v7x cores.
        block_rows = _round_up(pl.cdiv(rows, 2), sub)
    else:
        block_rows = rows  # tiny input: single full-extent block is legal
    grid = (pl.cdiv(rows, block_rows),)

    out2d = pl.pallas_call(
        _relu6_kernel,
        out_shape=jax.ShapeDtypeStruct((rows, lane), dtype),
        grid_spec=pltpu.PrefetchScalarGridSpec(
            num_scalar_prefetch=0,
            grid=grid,
            in_specs=[pl.BlockSpec((block_rows, lane), lambda i: (i, 0))],
            out_specs=pl.BlockSpec((block_rows, lane), lambda i: (i, 0)),
        ),
        compiler_params=pltpu.CompilerParams(
            dimension_semantics=("parallel",)),
        cost_estimate=pl.CostEstimate(
            flops=2 * n, transcendentals=0, bytes_accessed=2 * n * itemsize),
    )(x2d)

    out_flat = out2d.reshape(-1)
    if need_pad:
        out_flat = out_flat[:n]
    return out_flat.reshape(orig_shape)


if __name__ == "__main__":
    key = jax.random.PRNGKey(0)
    # NCHW input consistent with a conv-style activation: batch=2, C=4, H=W=16
    x = jax.random.normal(key, (2, 4, 16, 16), dtype=jnp.float32) * 5.0

    y = jax.block_until_ready(relu6_pallas(x))
    y_ref = jnp.clip(x, 0.0, 6.0)
    assert y.shape == x.shape and y.dtype == x.dtype
    assert jnp.allclose(y, y_ref), "mismatch vs reference"

    # Non-lane-aligned shape exercises the (tiny) pad + slice path.
    x2 = jax.random.normal(jax.random.PRNGKey(1), (3, 5, 7), dtype=jnp.float32) * 5.0
    y2 = jax.block_until_ready(relu6_pallas(x2))
    assert jnp.allclose(y2, jnp.clip(x2, 0.0, 6.0)), "mismatch vs reference (ragged)"

    # bf16 exercises the sublane-packed (16,128) block-sizing path.
    x3 = jax.random.normal(jax.random.PRNGKey(2), (2, 4, 16, 16),
                           dtype=jnp.bfloat16) * 5.0
    y3 = jax.block_until_ready(relu6_pallas(x3))
    assert jnp.allclose(y3.astype(jnp.float32),
                        jnp.clip(x3.astype(jnp.float32), 0.0, 6.0)), \
        "mismatch vs reference (bf16)"

    print("KERNEL_OK")
</pallas_src>

<mosaic_0001>
module attributes {stable_mosaic.version = 11 : i64} {
  func.func @_relu6_kernel(%arg0: i32, %arg1: memref<1x2048xf32, #tpu.memory_space<vmem>>, %arg2: memref<1x2048xf32, #tpu.memory_space<vmem>>) attributes {dimension_semantics = [#tpu.dimension_semantics<parallel>], iteration_bounds = array<i64: 1>, scalar_prefetch = 0 : i64, scratch_operands = 0 : i64, tpu.core_type = #tpu.core_type<tc>, window_params = [{transform_indices = @transform_0, window_bounds = array<i64: 1, 2048>}, {transform_indices = @transform_1, window_bounds = array<i64: 1, 2048>}]} {
    %c0 = arith.constant 0 : index
    %c0_0 = arith.constant 0 : index
    %0 = vector.load %arg1[%c0, %c0_0] : memref<1x2048xf32, #tpu.memory_space<vmem>>, vector<1x2048xf32>
    %cst = arith.constant 0.000000e+00 : f32
    %1 = vector.broadcast %cst : f32 to vector<1x2048xf32>
    %2 = arith.maximumf %0, %1 : vector<1x2048xf32>
    %cst_1 = arith.constant 6.000000e+00 : f32
    %3 = vector.broadcast %cst_1 : f32 to vector<1x2048xf32>
    %4 = arith.minimumf %2, %3 : vector<1x2048xf32>
    %c0_2 = arith.constant 0 : index
    %c0_3 = arith.constant 0 : index
    %5 = vector.load %arg2[%c0_2, %c0_3] : memref<1x2048xf32, #tpu.memory_space<vmem>>, vector<1x2048xf32>
    tpu.vector_store %arg2[%c0_2, %c0_3], %4 {strides = array<i32>} : memref<1x2048xf32, #tpu.memory_space<vmem>>, vector<1x2048xf32>,
    return
  }
  func.func @transform_0(%arg0: i32) -> (i32, i32) {
    %c0_i32 = arith.constant 0 : i32
    %c0_i32_0 = arith.constant 0 : i32
    return %arg0, %c0_i32 : i32, i32
  }
  func.func @transform_1(%arg0: i32) -> (i32, i32) {
    %c0_i32 = arith.constant 0 : i32
    %c0_i32_0 = arith.constant 0 : i32
    return %arg0, %c0_i32 : i32, i32
  }
}

</mosaic_0001>

<bundles_post_ra>
// kernel: relu6_pallas.1
= control target key start
LH: loop header
LB: loop body
LE: loop exit
PB: predicated region body
PF: predicated region fallthrough
CT: control target
= control target key end

     0   :  { %s42_s0 = inlined_call_operand.vmem [shape: f32[1,2048], index: 0, kind: input, shape index: {}]   ;;  %s43_s1 = inlined_call_operand.vmem [shape: f32[1,2048], index: 1, kind: output, shape index: {}]  }
   0x1   :  { %v8_v0 = vld [vmem:[%s42_s0] sm:$0xff]  ;;  %v9_v1 = vld [vmem:[%s42_s0 + $0x8] sm:$0xff] }
   0x2   :  { %v10_v2 = vmax.f32 %v8_v0, 0.0  ;;  %v11_v3 = vmax.f32 %v9_v1, 0.0 }
   0x4   :  { %v12_v4 = vmin.f32 %v10_v2, 6.0  ;;  %v13_v5 = vmin.f32 %v11_v3, 6.0 }
   0x6   :  { %14 = vst [vmem:[%s43_s1] sm:$0xff] %v12_v4 }
   0x7   :  { %15 = vst [vmem:[%s43_s1 + $0x8] sm:$0xff] %v13_v5 }

</bundles_post_ra>
